<compile_context>
chip_gen: v5e
topology: v5e:2x2
jax: 0.10.0
libtpu: 0.0.40
codegen_flags: <defaults>
</compile_context>

<pallas_src>
import functools
import math

import jax
import jax.numpy as jnp
from jax.experimental import pallas as pl
from jax.experimental.pallas import tpu as pltpu


def _milatten_kernel(x_ref, v_ref, w_ref, fusion_ref, soft_ref, *, matmul_dtype):
    # x_ref:      (Bt, N, D)  VMEM block of Bt batch rows
    # v_ref:      (D, dl)
    # w_ref:      (1, dl)     W^T, pre-scaled by 1/sqrt(dl) on the host
    # fusion_ref: (Bt, D)
    # soft_ref:   (Bt, N)     lane-dense output
    Bt, N, D = x_ref.shape
    dl = v_ref.shape[-1]

    x = x_ref[...]                               # input dtype (f32 or bf16)
    v = v_ref[...].astype(matmul_dtype)          # (D, dl)
    w = w_ref[...].astype(jnp.float32)           # (1, dl)

    # ---- x_ = tanh(x @ V): the only MXU matmul in this kernel -------------
    # Collapse (Bt, N) so the MXU sees Bt*N rows at once.  The collapse is a
    # free view when N is a multiple of the sublane packing (8 f32 / 16 bf16)
    # or Bt == 1; otherwise it materializes a small one-off VMEM relayout.
    # TODO(synk): for non-sublane-aligned N, padding N (+ masking the softmax)
    # would avoid that relayout copy; not needed for typical aligned N.
    xf = x.reshape(Bt * N, D).astype(matmul_dtype)
    h = jnp.tanh(jnp.dot(xf, v, preferred_element_type=jnp.float32))   # (Bt*N, dl) f32
    h3 = h.reshape(Bt, N, dl)

    # ---- dis = (x_ @ W) / sqrt(dl): VPU mul + XLU lane-reduce --------------
    # (a (M,128)@(128,1) MXU matmul would burn a full MXU pass for a single
    #  useful output lane; the vector-unit slots are otherwise idle here.)
    dis = jnp.sum(h3 * w, axis=-1)               # (Bt, N), lane-major

    # ---- softmax over the instance axis (lane axis) ------------------------
    m = jnp.max(dis, axis=-1, keepdims=True)     # (Bt, 1)
    e = jnp.exp(dis - m)                         # (Bt, N)
    soft = e / jnp.sum(e, axis=-1, keepdims=True)  # (Bt, N), f32

    soft_ref[...] = soft.astype(soft_ref.dtype)  # lane-dense store

    # ---- feat_fusion[b, :] = soft[b, :] @ x[b] ------------------------------
    if N >= 128:
        # Enough contraction depth for a worthwhile MXU batched matmul.
        fusion = jnp.einsum(
            'bqn,bnd->bqd',
            soft.reshape(Bt, 1, N).astype(matmul_dtype),
            x.astype(matmul_dtype),
            preferred_element_type=jnp.float32).reshape(Bt, D)
    else:
        # Small N: a q=1, K=N MXU push is nearly empty; do the weighted sum on
        # the VPU (mul) + sublane reduce instead.
        fusion = jnp.sum(soft[:, :, None] * x.astype(jnp.float32), axis=1)   # (Bt, D)

    fusion_ref[...] = fusion.astype(fusion_ref.dtype)


def milatten_forward(x, V, W, *, block_b=None, matmul_dtype=jnp.bfloat16):
    """x: (B, N, D), V: (D, dl), W: (dl, 1).

    Returns (feat_fusion (B, D), soft_assign (B, N)).
    """
    B, N, D = x.shape
    dl = V.shape[1]
    itemsize = jnp.dtype(x.dtype).itemsize
    mm_itemsize = jnp.dtype(matmul_dtype).itemsize

    # Fold the 1/sqrt(dl) softmax scale into W and pass it as a (1, dl) row so
    # the kernel can use a lane-reduce instead of a skinny MXU matmul.
    W_row = (jnp.asarray(W).reshape(1, dl) / math.sqrt(dl)).astype(jnp.float32)

    # ---- generation-aware VMEM budgeting ------------------------------------
    try:
        vmem_cap = int(pltpu.get_tpu_info().vmem_capacity_bytes)
    except Exception:
        vmem_cap = 64 * (1 << 20)            # conservative (v7x-sized) fallback
    vmem_cap = max(vmem_cap, 32 * (1 << 20))

    if block_b is None:
        # x block budget ~ VMEM/16 (8 MiB on 128 MiB v5e/v6e, 4 MiB on v7x's
        # 64 MiB): the x block is double-buffered and an equal-size f32 h plus
        # a bf16 copy live alongside it inside the kernel.
        x_block_budget = max(1 << 20, vmem_cap // 16)
        per_b_bytes = max(1, N * D * itemsize)
        block_b = max(1, x_block_budget // per_b_bytes)
        # Keep >= 2 grid steps when B allows it, so the "parallel" batch axis
        # can split across v7x's two TensorCores and pipelining has >1 step.
        if B >= 16:
            block_b = min(block_b, pl.cdiv(B, 2))
        # Sublane rule for the (block_b, D)/(block_b, N) output blocks:
        # block_b must be a multiple of 8, or equal to the full batch dim.
        if block_b >= B:
            block_b = B
        else:
            block_b = (block_b // 8) * 8
            if block_b == 0:
                block_b = min(8, B)
    grid_b = pl.cdiv(B, block_b)             # edge block padded if needed

    # Scoped VMEM: double-buffered blocks + in-kernel intermediates, capped at
    # ~75% of physical VMEM (headroom for compiler scratch; matters on v7x).
    est = (
        2 * block_b * N * D * itemsize                  # x block (x2 buffers)
        + 2 * (D * dl + dl) * itemsize                  # V, W row (x2 buffers)
        + 2 * block_b * (D + N) * itemsize              # outputs  (x2 buffers)
        + block_b * N * (D * mm_itemsize + dl * 4)      # cast xf + f32 h
        + block_b * N * D * 4                           # fusion broadcast temp
        + (2 << 20)                                     # headroom
    )
    vmem_limit = int(min(vmem_cap * 3 // 4, max(32 * (1 << 20), 2 * est)))

    kernel = functools.partial(_milatten_kernel, matmul_dtype=matmul_dtype)

    fusion, soft = pl.pallas_call(
        kernel,
        out_shape=(
            jax.ShapeDtypeStruct((B, D), x.dtype),
            jax.ShapeDtypeStruct((B, N), x.dtype),
        ),
        grid_spec=pltpu.PrefetchScalarGridSpec(
            num_scalar_prefetch=0,
            grid=(grid_b,),
            in_specs=[
                pl.BlockSpec((block_b, N, D), lambda b: (b, 0, 0)),
                pl.BlockSpec((D, dl), lambda b: (0, 0)),
                pl.BlockSpec((1, dl), lambda b: (0, 0)),
            ],
            out_specs=[
                pl.BlockSpec((block_b, D), lambda b: (b, 0)),
                pl.BlockSpec((block_b, N), lambda b: (b, 0)),
            ],
        ),
        compiler_params=pltpu.CompilerParams(
            dimension_semantics=("parallel",),
            vmem_limit_bytes=vmem_limit,
        ),
    )(x, V, W_row)

    return fusion, soft


def milatten_reference(x, V, W):
    dl = V.shape[1]
    h = jnp.tanh(jnp.matmul(x, V))                  # (B, N, dl)
    dis = jnp.matmul(h, W)[..., 0] / math.sqrt(dl)  # (B, N)
    soft = jax.nn.softmax(dis, axis=1)              # (B, N)
    fusion = jnp.sum(soft[..., None] * x, axis=1)   # (B, D)
    return fusion, soft


if __name__ == "__main__":
    # Small shapes consistent with the module: dim=D=128, dl=128, B=2, N=8.
    B, N, D, dl = 2, 8, 128, 128

    key = jax.random.PRNGKey(0)
    kx, kv, kw = jax.random.split(key, 3)

    x = jax.random.normal(kx, (B, N, D), dtype=jnp.float32)

    # Deterministic init matching MILAtten.reset_params:
    #   V ~ U(+-1/sqrt(dl*dim)), W ~ U(+-1/sqrt(dl))
    std1 = 1.0 / math.sqrt(dl * D)
    std2 = 1.0 / math.sqrt(dl)
    V = jax.random.uniform(kv, (D, dl), minval=-std1, maxval=std1, dtype=jnp.float32)
    W = jax.random.uniform(kw, (dl, 1), minval=-std2, maxval=std2, dtype=jnp.float32)

    ref_fusion, ref_soft = milatten_reference(x, V, W)

    # Exact-semantics path (f32 matmul inputs): tight tolerance.
    fusion32, soft32 = milatten_forward(x, V, W, matmul_dtype=jnp.float32)
    jax.block_until_ready((fusion32, soft32))
    assert jnp.allclose(fusion32, ref_fusion, atol=1e-5, rtol=1e-5)
    assert jnp.allclose(soft32, ref_soft, atol=1e-5, rtol=1e-5)

    # Fast path (bf16 matmul inputs, f32 accumulate): MXU-native on
    # v5e/v6e/v7x; tolerance loosened for bf16 input rounding.
    fusion_bf, soft_bf = milatten_forward(x, V, W, matmul_dtype=jnp.bfloat16)
    jax.block_until_ready((fusion_bf, soft_bf))
    assert jnp.allclose(fusion_bf, ref_fusion, atol=2e-3, rtol=2e-2)
    assert jnp.allclose(soft_bf, ref_soft, atol=2e-3, rtol=2e-2)

    print("KERNEL_OK")
</pallas_src>

<mosaic_0001>
module attributes {stable_mosaic.version = 11 : i64} {
  func.func @_milatten_kernel(%arg0: i32, %arg1: memref<2x8x128xf32, #tpu.memory_space<vmem>>, %arg2: memref<128x128xf32, #tpu.memory_space<vmem>>, %arg3: memref<1x128xf32, #tpu.memory_space<vmem>>, %arg4: memref<2x128xf32, #tpu.memory_space<vmem>>, %arg5: memref<2x8xf32, #tpu.memory_space<vmem>>) attributes {dimension_semantics = [#tpu.dimension_semantics<parallel>], iteration_bounds = array<i64: 1>, scalar_prefetch = 0 : i64, scratch_operands = 0 : i64, tpu.core_type = #tpu.core_type<tc>, window_params = [{transform_indices = @transform_0, window_bounds = array<i64: 2, 8, 128>}, {pipeline_mode = #tpu.pipeline_mode<synchronous>, transform_indices = @transform_1, window_bounds = array<i64: 128, 128>}, {pipeline_mode = #tpu.pipeline_mode<synchronous>, transform_indices = @transform_2, window_bounds = array<i64: 1, 128>}, {transform_indices = @transform_3, window_bounds = array<i64: 2, 128>}, {transform_indices = @transform_4, window_bounds = array<i64: 2, 8>}]} {
    %c0 = arith.constant 0 : index
    %c0_0 = arith.constant 0 : index
    %c0_1 = arith.constant 0 : index
    %0 = vector.load %arg1[%c0, %c0_0, %c0_1] : memref<2x8x128xf32, #tpu.memory_space<vmem>>, vector<2x8x128xf32>
    %c0_2 = arith.constant 0 : index
    %c0_3 = arith.constant 0 : index
    %1 = vector.load %arg2[%c0_2, %c0_3] : memref<128x128xf32, #tpu.memory_space<vmem>>, vector<128x128xf32>
    %c0_4 = arith.constant 0 : index
    %c0_5 = arith.constant 0 : index
    %2 = vector.load %arg3[%c0_4, %c0_5] : memref<1x128xf32, #tpu.memory_space<vmem>>, vector<1x128xf32>
    %3 = vector.shape_cast %0 : vector<2x8x128xf32> to vector<16x128xf32>
    %cst = arith.constant dense<0.000000e+00> : vector<16x128xf32>
    %4 = tpu.matmul %3, %1, %cst {dimension_numbers = #tpu.dot_dimension_numbers<[1], [0], [0], [1], [0, 0, 1, 1], [], []>} : vector<16x128xf32>, vector<128x128xf32>, vector<16x128xf32> -> vector<16x128xf32>
    %5 = math.tanh %4 : vector<16x128xf32>
    %6 = vector.shape_cast %5 : vector<16x128xf32> to vector<2x8x128xf32>
    %7 = vector.shape_cast %2 : vector<1x128xf32> to vector<1x1x128xf32>
    %8 = vector.broadcast %7 : vector<1x1x128xf32> to vector<2x8x128xf32>
    %9 = arith.mulf %6, %8 : vector<2x8x128xf32>
    %cst_6 = arith.constant dense<0.000000e+00> : vector<2x8xf32>
    %10 = vector.multi_reduction <add>, %9, %cst_6 [2] : vector<2x8x128xf32> to vector<2x8xf32>
    %cst_7 = arith.constant dense<0xFF800000> : vector<2xf32>
    %11 = vector.multi_reduction <maximumf>, %10, %cst_7 [1] : vector<2x8xf32> to vector<2xf32>
    %12 = vector.shape_cast %11 : vector<2xf32> to vector<2x1xf32>
    %13 = vector.broadcast %12 : vector<2x1xf32> to vector<2x8xf32>
    %14 = arith.subf %10, %13 : vector<2x8xf32>
    %15 = math.exp %14 : vector<2x8xf32>
    %cst_8 = arith.constant dense<0.000000e+00> : vector<2xf32>
    %16 = vector.multi_reduction <add>, %15, %cst_8 [1] : vector<2x8xf32> to vector<2xf32>
    %17 = vector.shape_cast %16 : vector<2xf32> to vector<2x1xf32>
    %18 = vector.broadcast %17 : vector<2x1xf32> to vector<2x8xf32>
    %19 = arith.divf %15, %18 : vector<2x8xf32>
    %c0_9 = arith.constant 0 : index
    %c0_10 = arith.constant 0 : index
    %20 = vector.load %arg5[%c0_9, %c0_10] : memref<2x8xf32, #tpu.memory_space<vmem>>, vector<2x8xf32>
    tpu.vector_store %arg5[%c0_9, %c0_10], %19 {strides = array<i32>} : memref<2x8xf32, #tpu.memory_space<vmem>>, vector<2x8xf32>,
    %21 = vector.shape_cast %19 : vector<2x8xf32> to vector<2x8x1xf32>
    %22 = vector.broadcast %21 : vector<2x8x1xf32> to vector<2x8x128xf32>
    %23 = arith.mulf %22, %0 : vector<2x8x128xf32>
    %cst_11 = arith.constant dense<0.000000e+00> : vector<2x128xf32>
    %24 = vector.multi_reduction <add>, %23, %cst_11 [1] : vector<2x8x128xf32> to vector<2x128xf32>
    %c0_12 = arith.constant 0 : index
    %c0_13 = arith.constant 0 : index
    %25 = vector.load %arg4[%c0_12, %c0_13] : memref<2x128xf32, #tpu.memory_space<vmem>>, vector<2x128xf32>
    tpu.vector_store %arg4[%c0_12, %c0_13], %24 {strides = array<i32>} : memref<2x128xf32, #tpu.memory_space<vmem>>, vector<2x128xf32>,
    return
  }
  func.func @transform_0(%arg0: i32) -> (i32, i32, i32) {
    %c0_i32 = arith.constant 0 : i32
    %c0_i32_0 = arith.constant 0 : i32
    %c0_i32_1 = arith.constant 0 : i32
    return %arg0, %c0_i32, %c0_i32_0 : i32, i32, i32
  }
  func.func @transform_1(%arg0: i32) -> (i32, i32) {
    %c0_i32 = arith.constant 0 : i32
    %c0_i32_0 = arith.constant 0 : i32
    %c0_i32_1 = arith.constant 0 : i32
    return %c0_i32, %c0_i32_0 : i32, i32
  }
  func.func @transform_2(%arg0: i32) -> (i32, i32) {
    %c0_i32 = arith.constant 0 : i32
    %c0_i32_0 = arith.constant 0 : i32
    %c0_i32_1 = arith.constant 0 : i32
    return %c0_i32, %c0_i32_0 : i32, i32
  }
  func.func @transform_3(%arg0: i32) -> (i32, i32) {
    %c0_i32 = arith.constant 0 : i32
    %c0_i32_0 = arith.constant 0 : i32
    return %arg0, %c0_i32 : i32, i32
  }
  func.func @transform_4(%arg0: i32) -> (i32, i32) {
    %c0_i32 = arith.constant 0 : i32
    %c0_i32_0 = arith.constant 0 : i32
    return %arg0, %c0_i32 : i32, i32
  }
}

</mosaic_0001>

<bundles_post_ra>
// kernel: tpu_custom_call.1
= control target key start
LH: loop header
LB: loop body
LE: loop exit
PB: predicated region body
PF: predicated region fallthrough
CT: control target
= control target key end

     0   :  { %10 = vsyncpa [#allocation3], 0  ;;  %s458_s0 = inlined_call_operand.hbm [shape: f32[2,8,128], index: 0, kind: input, shape index: {}]   ;;  %s459_s1 = inlined_call_operand.hbm [shape: f32[128,128], index: 1, kind: input, shape index: {}]   ;;  %s460_s2 = inlined_call_operand.vmem [shape: f32[1,128], index: 2, kind: input, shape index: {}]   ;;  %s461_s3 = inlined_call_operand.hbm [shape: f32[2,128], index: 3, kind: output, shape index: {0}]   ;;  %s462_s4 = inlined_call_operand.hbm [shape: f32[2,8], index: 4, kind: output, shape index: {1}]  }
   0x1   :  { %11 = vsyncpa [#allocation6], 0 }
   0x2   :  { %12 = vsyncpa [#allocation4], 0 }
   0x3   :  { %13 = vsyncpa [#allocation9], 0  ;;  %s18_s17 = sshll.u32 %s458_s0, 4  ;;  %s388_s18 = smov [#allocation2]   ;;  %s19_s17 = int_to_ptr.hbm [resolvable:$true] %s18_s17 }
   0x4   :  { %s20_s19 = sshll.u32 %s388_s18, 4  ;;  %s31_s22 = sshll.u32 %s459_s1, 4  ;;  %s21_s19 = int_to_ptr.vmem [resolvable:$true] %s20_s19  ;;  %s32_s22 = int_to_ptr.hbm [resolvable:$true] %s31_s22 }
   0x5   :  { %s389_s23 = smov 128   ;;  %s390_s24 = smov 8  }
   0x6   :  { %26 = dma.hbm_to_vmem [thread:$0]  %s19_s17, 256, %s21_s19, [#allocation3], %s389_s23, %s389_s23, %s390_s24  }
   0x7   :  { %s391_s25 = smov [#allocation5]  }
   0x8   :  { %s33_s26 = sshll.u32 %s391_s25, 4  ;;  %s34_s26 = int_to_ptr.vmem [resolvable:$true] %s33_s26 }
   0x9   :  { %39 = dma.hbm_to_vmem [thread:$0]  %s32_s22, 2048, %s34_s26, [#allocation6], %s389_s23, %s389_s23, %s390_s24  }
   0xa   :  { %380 = dma.done.wait [#allocation3], 256  }
   0xb   :  { %381 = vsyncadd [#allocation3], 4294967040 }
   0xc   :  { %382 = dma.done.wait [#allocation6], 2048  }
   0xd   :  { %383 = vsyncadd [#allocation6], 4294965248  ;;  %v67_v0 = vld [vmem:[#allocation5 + $0x78] sm:$0xff]  ;;  %v66_v1 = vld [vmem:[#allocation5 + $0x70] sm:$0xff]  ;;  %v105_v26 = vlaneseq  ;;  %vm109_vm0 = vcmask 1041409   ;;  %vm112_vm1 = vcmask 58368  }
   0xe   :  { %69 = vmatpush.msra.mxu0 %v67_v0  ;;  %245 = vmatpush.msra.mxu1 %v67_v0  ;;  %v65_v2 = vld [vmem:[#allocation5 + $0x68] sm:$0xff]  ;;  %v64_v3 = vld [vmem:[#allocation5 + $0x60] sm:$0xff]  ;;  %v63_v4 = vld [vmem:[#allocation5 + $0x58] sm:$0xff]  ;;  %v392_v33 = vmov 0   ;;  %s229_s30 = sshll.u32 %s462_s4, 4  ;;  %s394_s4 = smov [#allocation7]   ;;  %s230_s30 = int_to_ptr.hbm [resolvable:$true] %s229_s30 }
   0xf   :  { %v62_v5 = vld [vmem:[#allocation5 + $0x50] sm:$0xff]  ;;  %v61_v6 = vld [vmem:[#allocation5 + $0x48] sm:$0xff]  ;;  %v60_v7 = vld [vmem:[#allocation5 + $0x40] sm:$0xff]  ;;  %v435_v27 = vand.u32 127, %v105_v26  ;;  %269 = vset.pattern.permute.xlu2 %v392_v33  ;;  %268 = vset.pattern.permute.xlu1 %v392_v33  ;;  %s216_s5 = sshll.u32 %s394_s4, 4  ;;  %s218_s8 = sshll.u32 %s461_s3, 4  ;;  %s217_s5 = int_to_ptr.vmem [resolvable:$true] %s216_s5  ;;  %s219_s8 = int_to_ptr.hbm [resolvable:$true] %s218_s8 }
  0x10   :  { %70 = vmatpush.msra.mxu0 %v66_v1  ;;  %246 = vmatpush.msra.mxu1 %v66_v1  ;;  %v59_v8 = vld [vmem:[#allocation5 + $0x38] sm:$0xff]  ;;  %v58_v9 = vld [vmem:[#allocation5 + $0x30] sm:$0xff]  ;;  %v57_v10 = vld [vmem:[#allocation5 + $0x28] sm:$0xff] }
  0x11   :  { %v56_v11 = vld [vmem:[#allocation5 + $0x20] sm:$0xff]  ;;  %v55_v12 = vld [vmem:[#allocation5 + $0x18] sm:$0xff]  ;;  %v54_v13 = vld [vmem:[#allocation5 + $0x10] sm:$0xff]  ;;  %270 = vset.pattern.permute.xlu0 %v392_v33 }
  0x12   :  { %71 = vmatpush.msra.mxu0 %v65_v2  ;;  %247 = vmatpush.msra.mxu1 %v65_v2  ;;  %v53_v14 = vld [vmem:[#allocation5 + $0x8] sm:$0xff]  ;;  %v52_v15 = vld [vmem:[#allocation5] sm:$0xff]  ;;  %v426_v16 = vld [vmem:[#allocation2] sm:$0xff] }
  0x13   :  { %v428_v17 = vld [vmem:[#allocation2 + $0x8] sm:$0xff]  ;;  %v271_v20 = vld [vmem:[%s460_s2] ss:$0 sm:$0xff]  ;;  %s393_s2 = smov [#allocation8]  }
  0x14   :  { %72 = vmatpush.msra.mxu0 %v64_v3  ;;  %248 = vmatpush.msra.mxu1 %v64_v3  ;;  %s227_s27 = sshll.u32 %s393_s2, 4  ;;  %s228_s27 = int_to_ptr.vmem [resolvable:$true] %s227_s27 }
  0x16   :  { %73 = vmatpush.msra.mxu0 %v63_v4  ;;  %249 = vmatpush.msra.mxu1 %v63_v4 }
  0x18   :  { %74 = vmatpush.msra.mxu0 %v62_v5  ;;  %250 = vmatpush.msra.mxu1 %v62_v5 }
  0x1a   :  { %75 = vmatpush.msra.mxu0 %v61_v6  ;;  %251 = vmatpush.msra.mxu1 %v61_v6 }
  0x1c   :  { %76 = vmatpush.msra.mxu0 %v60_v7  ;;  %252 = vmatpush.msra.mxu1 %v60_v7 }
  0x1e   :  { %77 = vmatpush.msra.mxu0 %v59_v8  ;;  %253 = vmatpush.msra.mxu1 %v59_v8 }
  0x20   :  { %78 = vmatpush.msra.mxu0 %v58_v9  ;;  %254 = vmatpush.msra.mxu1 %v58_v9 }
  0x22   :  { %79 = vmatpush.msra.mxu0 %v57_v10  ;;  %255 = vmatpush.msra.mxu1 %v57_v10 }
  0x24   :  { %80 = vmatpush.msra.mxu0 %v56_v11  ;;  %256 = vmatpush.msra.mxu1 %v56_v11 }
  0x26   :  { %81 = vmatpush.msra.mxu0 %v55_v12  ;;  %257 = vmatpush.msra.mxu1 %v55_v12 }
  0x28   :  { %82 = vmatpush.msra.mxu0 %v54_v13  ;;  %258 = vmatpush.msra.mxu1 %v54_v13 }
  0x2a   :  { %83 = vmatpush.msra.mxu0 %v53_v14  ;;  %259 = vmatpush.msra.mxu1 %v53_v14 }
  0x2c   :  { %84 = vmatpush.msra.mxu0 %v52_v15  ;;  %260 = vmatpush.msra.mxu1 %v52_v15 }
  0x2d   :  { %85 = vmatmul.f32.vlgmr.msra.gmra.mxu0 %v426_v16  ;;  %88 = vmatmul.f32.vlgmr.msra.gmra.mxu1 %v428_v17 }
  0xaa   :  { %v86_v18 = vpop.f32.mrf.mxu0  ;;  %v89_v19 = vpop.f32.mrf.mxu1 }
  0xab   :  { %272 = vtanh.f32 %v86_v18 }
  0xac   :  { %274 = vtanh.f32 %v89_v19 }
  0xb1   :  { %v273_v21 = vpop.eup %272 }
  0xb2   :  { %v97_v22 = vmul.f32 %v273_v21, %v271_v20  ;;  %v275_v23 = vpop.eup %274 }
  0xb3   :  { %v98_v24 = vmul.f32 %v275_v23, %v271_v20 }
  0xb4   :  { %99 = vadd.xlane.f32.xlu0 %v97_v22 }
  0xbc   :  { %101 = vadd.xlane.f32.xlu0 %v98_v24 }
 0x127   :  { %v100_v25 = vpop.xlane.xlu0 %99 }
 0x128   :  { %v107_v29 = vperm.slane %v100_v25, %v435_v27 }
 0x12f   :  { %v102_v28 = vpop.xlane.xlu0 %101 }
 0x130   :  { %v108_v30 = vperm.slane %v102_v28, %v435_v27 }
 0x132   :  { %v110_v31 = vsel %vm109_vm0, %v108_v30, %v107_v29 }
 0x133   :  { %v113_v32 = vsel %vm112_vm1, %v110_v31, -inf }
 0x134   :  { %114 = vmax.xlane.f32.xlu1 %v113_v32 }
 0x1a7   :  { %v115_v34 = vpop.xlane.xlu1 %114 }
 0x1a8   :  { %v117_v35 = vperm.slane %v115_v34, 0  ;;  %v118_v36 = vperm.slane %v115_v34, 1 }
 0x1aa   :  { %v121_v37 = vsub.f32 %v100_v25, %v117_v35  ;;  %v122_v38 = vsub.f32 %v102_v28, %v118_v36 }
 0x1ac   :  { %v123_v39 = vmul.f32 1.442695, %v121_v37  ;;  %v125_v40 = vmul.f32 1.442695, %v122_v38 }
 0x1ae   :  { %276 = vpow2.f32 %v123_v39 }
 0x1af   :  { %278 = vpow2.f32 %v125_v40 }
 0x1b4   :  { %v277_v41 = vpop.eup %276 }
 0x1b5   :  { %v279_v42 = vpop.eup %278  ;;  %130 = vperm.xlu1 %268, %v277_v41  }
 0x1b6   :  { %133 = vperm.xlu2 %269, %v279_v42  }
 0x210   :  { %v134_v43 = vpop.permute.xlu2 %133 }
 0x211   :  { %v136_v45 = vperm.slane %v134_v43, %v435_v27 }
 0x227   :  { %v131_v44 = vpop.permute.xlu1 %130 }
 0x228   :  { %v135_v46 = vperm.slane %v131_v44, %v435_v27 }
 0x22a   :  { %v137_v47 = vsel %vm109_vm0, %v136_v45, %v135_v46 }
 0x22b   :  { %v139_v48 = vsel %vm112_vm1, %v137_v47, 0.0 }
 0x22c   :  { %140 = vadd.xlane.f32.xlu2 %v139_v48 }
 0x29f   :  { %v141_v49 = vpop.xlane.xlu2 %140 }
 0x2a0   :  { %v143_v50 = vperm.slane %v141_v49, 0  ;;  %v144_v51 = vperm.slane %v141_v49, 1 }
 0x2a2   :  { %280 = vrcp.f32 %v143_v50  ;;  %v158_v58 = vand.u32 2147483648, %v143_v50  ;;  %v173_v59 = vand.u32 2147483648, %v144_v51  ;;  %v156_v61 = vand.u32 2147483647, %v143_v50 }
 0x2a3   :  { %282 = vrcp.f32 %v144_v51  ;;  %v171_v63 = vand.u32 2147483647, %v144_v51  ;;  %vm152_vm4 = vweird.f32 %v143_v50  ;;  %vm167_vm5 = vweird.f32 %v144_v51 }
 0x2a4   :  { %v159_v2 = vor.u32 1.1754944e-38, %v158_v58  ;;  %v174_v3 = vor.u32 1.1754944e-38, %v173_v59  ;;  %vm157_vm8 = vcmp.eq.f32.partialorder %v156_v61, 8.507059e+37 }
 0x2a5   :  { %vm172_vm9 = vcmp.eq.f32.partialorder %v171_v63, 8.507059e+37 }
 0x2a8   :  { %v281_v52 = vpop.eup %280 }
 0x2a9   :  { %v283_v53 = vpop.eup %282  ;;  %v148_v54 = vmul.f32 %v281_v52, %v143_v50  ;;  %vm153_vm2 = vweird.f32 %v281_v52 }
 0x2aa   :  { %v163_v55 = vmul.f32 %v283_v53, %v144_v51  ;;  %vm168_vm3 = vweird.f32 %v283_v53  ;;  %vm154_vm6 = vmor %vm152_vm4, %vm153_vm2 }
 0x2ab   :  { %v149_v56 = vsub.f32 1.0, %v148_v54  ;;  %vm169_vm7 = vmor %vm167_vm5, %vm168_vm3 }
 0x2ac   :  { %v164_v57 = vsub.f32 1.0, %v163_v55 }
 0x2ad   :  { %v150_v60 = vmul.f32 %v281_v52, %v149_v56 }
 0x2ae   :  { %v165_v62 = vmul.f32 %v283_v53, %v164_v57 }
 0x2af   :  { %v151_v0 = vadd.f32 %v281_v52, %v150_v60 }
 0x2b0   :  { %v166_v1 = vadd.f32 %v283_v53, %v165_v62 }
 0x2b1   :  { %v155_v4 = vsel %vm154_vm6, %v281_v52, %v151_v0 }
 0x2b2   :  { %v170_v5 = vsel %vm169_vm7, %v283_v53, %v166_v1  ;;  %v160_v6 = vsel %vm157_vm8, %v159_v2, %v155_v4 }
 0x2b3   :  { %v175_v7 = vsel %vm172_vm9, %v174_v3, %v170_v5  ;;  %v161_v8 = vmul.f32 %v277_v41, %v160_v6 }
 0x2b4   :  { %v176_v9 = vmul.f32 %v279_v42, %v175_v7 }
 0x2b5   :  { %180 = vperm.xlu0 %270, %v161_v8  }
 0x2b6   :  { %183 = vperm.xlu1 %268, %v176_v9  }
 0x327   :  { %v181_v10 = vpop.permute.xlu0 %180 }
 0x328   :  { %v184_v11 = vpop.permute.xlu1 %183  ;;  %v185_v12 = vperm.slane %v181_v10, %v435_v27  ;;  %v192_v13 = vmul.f32 %v181_v10, %v426_v16 }
 0x329   :  { %v186_v14 = vperm.slane %v184_v11, %v435_v27  ;;  %v193_v15 = vmul.f32 %v184_v11, %v428_v17 }
 0x32a   :  { %v194_v18 = vrot.slane %v192_v13, 4 }
 0x32b   :  { %v200_v19 = vrot.slane %v193_v15, 4  ;;  %v187_v20 = vsel %vm109_vm0, %v186_v14, %v185_v12 }
 0x32c   :  { %v195_v21 = vadd.f32 %v194_v18, %v192_v13  ;;  %189 = vst.msk [vmem:[#allocation8] sm:$0x3] %vm112_vm1, %v187_v20 }
 0x32d   :  { %v201_v22 = vadd.f32 %v200_v19, %v193_v15  ;;  %232 = dma.vmem_to_hbm [thread:$0]  %s228_s27, 32, %s230_s30, [#allocation9]  }
 0x32e   :  { %v196_v23 = vrot.slane %v195_v21, 2 }
 0x32f   :  { %v202_v24 = vrot.slane %v201_v22, 2 }
 0x330   :  { %v197_v25 = vadd.f32 %v196_v23, %v195_v21 }
 0x331   :  { %v203_v26 = vadd.f32 %v202_v24, %v201_v22 }
 0x332   :  { %v198_v16 = vrot.slane %v197_v25, 1 }
 0x333   :  { %v204_v28 = vrot.slane %v203_v26, 1 }
 0x334   :  { %v199_v17 = vadd.f32 %v198_v16, %v197_v25 }
 0x335   :  { %v205_v27 = vadd.f32 %v204_v28, %v203_v26 }
 0x337   :  { %v208_v29 = vsel %vm109_vm0, %v205_v27, %v199_v17 }
 0x338   :  { %210 = vst [vmem:[#allocation7] sm:$0x3] %v208_v29 }
 0x339   :  { %221 = dma.vmem_to_hbm [thread:$0]  %s217_s5, 32, %s219_s8, [#allocation4]  }
 0x33a   :  { %384 = dma.done.wait [#allocation4], 32  }
 0x33b   :  { %385 = vsyncadd [#allocation4], 4294967264 }
 0x33c   :  { %386 = dma.done.wait [#allocation9], 32  }
 0x33d   :  { %387 = vsyncadd [#allocation9], 4294967264 }
 0x33e   :  { %241 = vsyncpa [#allocation3], 1 }
 0x33f   :  { %242 = vsyncpa [#allocation6], 1 }
 0x340   :  { %243 = vsyncpa [#allocation4], 1 }
 0x341   :  { %244 = vsyncpa [#allocation9], 1 }

</bundles_post_ra>
